<compile_context>
chip_gen: v6e
topology: v6e:2x2x1
jax: 0.10.0
libtpu: 0.0.40
codegen_flags: <defaults>
</compile_context>

<pallas_src>
import jax
import jax.numpy as jnp
import numpy as np
from jax.experimental import pallas as pl
from jax.experimental.pallas import tpu as pltpu


def _hnet_kernel(emb_ref, wht_ref, bh_ref, out_ref):
    # emb_ref: (C, E)   condition embeddings (same block for every grid step)
    # wht_ref: (E, TP)  pre-transposed fused [to_weight; to_bias] tile
    # bh_ref:  (1, TP)  fused bias tile
    # out_ref: (C, TP)  generated flat-parameter tile
    out_ref[...] = (
        jnp.dot(emb_ref[...], wht_ref[...], preferred_element_type=jnp.float32)
        + bh_ref[...]
    ).astype(out_ref.dtype)


class HyperNetworkPallas:
    """Pallas/TPU port of the torch HyperNetwork module."""

    def __init__(self, param_shapes, cond_emb_dim, num_cond_embs,
                 key=None, p_tile=2048):
        self.param_shapes = [tuple(s) for s in param_shapes]
        self.D1, self.D2 = self.param_shapes[0]     # generated weight shape
        self.Db = self.param_shapes[1][0]           # to_bias output size
        self.Dv = self.param_shapes[0][1]           # bias view length (spec: .view(D2))
        assert self.Db == self.Dv, \
            "spec's bias .view requires param_shapes[1][0] == param_shapes[0][1]"
        self.E = int(cond_emb_dim)
        self.P = self.D1 * self.D2 + self.Db

        # Lane-aligned tile of the P axis (multiple of 128), else full extent.
        if self.P % 128 == 0:
            self.TP = max(128, min((int(p_tile) // 128) * 128, self.P))
        else:
            self.TP = self.P

        key = jax.random.PRNGKey(0) if key is None else key
        k_emb, k_w, k_b, k_wb, k_bb = jax.random.split(key, 5)
        # TODO(synk): torch default inits (Embedding N(0,1), Linear U(+-1/sqrt(E)))
        # replaced by deterministic scaled-normal stand-ins; shapes match exactly.
        self.cond_embs = jax.random.normal(
            k_emb, (num_cond_embs, self.E), jnp.float32)
        to_weight_w = jax.random.normal(
            k_w, (self.D1 * self.D2, self.E), jnp.float32) / jnp.sqrt(self.E)
        to_bias_w = jax.random.normal(
            k_b, (self.Db, self.E), jnp.float32) / jnp.sqrt(self.E)
        to_weight_b = 0.01 * jax.random.normal(k_wb, (self.D1 * self.D2,), jnp.float32)
        to_bias_b = 0.01 * jax.random.normal(k_bb, (self.Db,), jnp.float32)

        # Fuse to_weight / to_bias and pre-transpose ONCE at init (not per call).
        self.fused_wT = jnp.concatenate([to_weight_w, to_bias_w], axis=0).T  # (E, P)
        self.fused_b = jnp.concatenate([to_weight_b, to_bias_b])[None, :]    # (1, P)
        # Torch-layout copies kept only for the reference check in __main__.
        self._ref_params = (to_weight_w, to_weight_b, to_bias_w, to_bias_b)

    def _generate_flat(self, emb):
        C, E = emb.shape
        TP = self.TP
        grid = (pl.cdiv(self.P, TP),)
        return pl.pallas_call(
            _hnet_kernel,
            out_shape=jax.ShapeDtypeStruct((C, self.P), jnp.float32),
            grid=grid,
            in_specs=[
                pl.BlockSpec((C, E), lambda p: (0, 0)),       # embeddings (resident)
                pl.BlockSpec((E, TP), lambda p: (0, p)),      # fused weight stream
                pl.BlockSpec((1, TP), lambda p: (0, p)),      # fused bias stream
            ],
            out_specs=pl.BlockSpec((C, TP), lambda p: (0, p)),
            compiler_params=pltpu.CompilerParams(
                dimension_semantics=("parallel",)),           # shards P across TCs on v7x
        )(emb, self.fused_wT, self.fused_b)

    def forward(self, cond_id):
        if isinstance(cond_id, (list, tuple)):
            cond_list = list(cond_id)
        else:
            cond_list = [cond_id]
        C = len(cond_list)
        ids = jnp.asarray(cond_list, jnp.int32)
        emb = jnp.take(self.cond_embs, ids, axis=0)           # (C, E) gather (glue)

        flat = self._generate_flat(emb)                        # (C, P) lane-dense slab
        nW = self.D1 * self.D2
        weights = flat[:, :nW].reshape(C, self.D1, self.D2)
        biases = flat[:, nW:].reshape(C, self.Dv)

        params = [[weights[i], biases[i]] for i in range(C)]
        return params[0] if C == 1 else params


if __name__ == "__main__":
    # Small, module-consistent shapes: generated weight (7, 64), bias (64,),
    # cond_emb_dim=8, 3 condition embeddings.  P = 7*64 + 64 = 512.
    param_shapes = [(7, 64), (64,)]
    cond_emb_dim = 8
    num_cond_embs = 3

    model = HyperNetworkPallas(
        param_shapes, cond_emb_dim, num_cond_embs,
        key=jax.random.PRNGKey(0),
        p_tile=128)   # small tile in the demo so the P-grid (4 steps) is exercised

    # Multi-condition path (returns a list of [weight, bias] pairs).
    conds = [0, 2]
    params = model.forward(conds)
    params = jax.tree_util.tree_map(jax.block_until_ready, params)

    # Single-condition path (returns [weight, bias] directly).
    single = model.forward(1)
    single = jax.tree_util.tree_map(jax.block_until_ready, single)

    # Pure-numpy reference (torch-convention layouts).
    to_weight_w, to_weight_b, to_bias_w, to_bias_b = (
        np.asarray(a) for a in model._ref_params)
    emb_all = np.asarray(model.cond_embs)
    D1, D2 = param_shapes[0]

    def ref(cid):
        e = emb_all[cid]
        w = (e @ to_weight_w.T + to_weight_b).reshape(D1, D2)
        b = (e @ to_bias_w.T + to_bias_b).reshape(param_shapes[0][1])
        return w, b

    for i, cid in enumerate(conds):
        w_ref, b_ref = ref(cid)
        np.testing.assert_allclose(np.asarray(params[i][0]), w_ref, rtol=1e-5, atol=1e-5)
        np.testing.assert_allclose(np.asarray(params[i][1]), b_ref, rtol=1e-5, atol=1e-5)

    w1_ref, b1_ref = ref(1)
    np.testing.assert_allclose(np.asarray(single[0]), w1_ref, rtol=1e-5, atol=1e-5)
    np.testing.assert_allclose(np.asarray(single[1]), b1_ref, rtol=1e-5, atol=1e-5)

    print("KERNEL_OK")
</pallas_src>

<mosaic_0001>
module attributes {stable_mosaic.version = 11 : i64} {
  func.func @_hnet_kernel(%arg0: i32, %arg1: memref<2x8xf32, #tpu.memory_space<vmem>>, %arg2: memref<8x128xf32, #tpu.memory_space<vmem>>, %arg3: memref<1x128xf32, #tpu.memory_space<vmem>>, %arg4: memref<2x128xf32, #tpu.memory_space<vmem>>) attributes {dimension_semantics = [#tpu.dimension_semantics<parallel>], iteration_bounds = array<i64: 4>, scalar_prefetch = 0 : i64, scratch_operands = 0 : i64, tpu.core_type = #tpu.core_type<tc>, window_params = [{pipeline_mode = #tpu.pipeline_mode<synchronous>, transform_indices = @transform_0, window_bounds = array<i64: 2, 8>}, {transform_indices = @transform_1, window_bounds = array<i64: 8, 128>}, {transform_indices = @transform_2, window_bounds = array<i64: 1, 128>}, {transform_indices = @transform_3, window_bounds = array<i64: 2, 128>}]} {
    %c0 = arith.constant 0 : index
    %c0_0 = arith.constant 0 : index
    %0 = vector.load %arg1[%c0, %c0_0] : memref<2x8xf32, #tpu.memory_space<vmem>>, vector<2x8xf32>
    %c0_1 = arith.constant 0 : index
    %c0_2 = arith.constant 0 : index
    %1 = vector.load %arg2[%c0_1, %c0_2] : memref<8x128xf32, #tpu.memory_space<vmem>>, vector<8x128xf32>
    %cst = arith.constant dense<0.000000e+00> : vector<2x128xf32>
    %2 = tpu.matmul %0, %1, %cst {dimension_numbers = #tpu.dot_dimension_numbers<[1], [0], [0], [1], [0, 0, 1, 1], [], []>} : vector<2x8xf32>, vector<8x128xf32>, vector<2x128xf32> -> vector<2x128xf32>
    %c0_3 = arith.constant 0 : index
    %c0_4 = arith.constant 0 : index
    %3 = vector.load %arg3[%c0_3, %c0_4] : memref<1x128xf32, #tpu.memory_space<vmem>>, vector<1x128xf32>
    %4 = vector.broadcast %3 : vector<1x128xf32> to vector<2x128xf32>
    %5 = arith.addf %2, %4 : vector<2x128xf32>
    %c0_5 = arith.constant 0 : index
    %c0_6 = arith.constant 0 : index
    %6 = vector.load %arg4[%c0_5, %c0_6] : memref<2x128xf32, #tpu.memory_space<vmem>>, vector<2x128xf32>
    tpu.vector_store %arg4[%c0_5, %c0_6], %5 {strides = array<i32>} : memref<2x128xf32, #tpu.memory_space<vmem>>, vector<2x128xf32>,
    return
  }
  func.func @transform_0(%arg0: i32) -> (i32, i32) {
    %c0_i32 = arith.constant 0 : i32
    %c0_i32_0 = arith.constant 0 : i32
    %c0_i32_1 = arith.constant 0 : i32
    return %c0_i32, %c0_i32_0 : i32, i32
  }
  func.func @transform_1(%arg0: i32) -> (i32, i32) {
    %c0_i32 = arith.constant 0 : i32
    %c0_i32_0 = arith.constant 0 : i32
    return %c0_i32, %arg0 : i32, i32
  }
  func.func @transform_2(%arg0: i32) -> (i32, i32) {
    %c0_i32 = arith.constant 0 : i32
    %c0_i32_0 = arith.constant 0 : i32
    return %c0_i32, %arg0 : i32, i32
  }
  func.func @transform_3(%arg0: i32) -> (i32, i32) {
    %c0_i32 = arith.constant 0 : i32
    %c0_i32_0 = arith.constant 0 : i32
    return %c0_i32, %arg0 : i32, i32
  }
}

</mosaic_0001>

<bundles_post_ra>
// kernel: tpu_custom_call.1
= control target key start
LH: loop header
LB: loop body
LE: loop exit
PB: predicated region body
PF: predicated region fallthrough
CT: control target
= control target key end

     0   :  { %8 = vsyncpa [#allocation3], 0  ;;  %s903_s0 = inlined_call_operand.hbm [shape: f32[2,8], index: 0, kind: input, shape index: {}]   ;;  %s904_s1 = inlined_call_operand.hbm [shape: f32[8,512], index: 1, kind: input, shape index: {}]   ;;  %s905_s2 = inlined_call_operand.hbm [shape: f32[1,512], index: 2, kind: input, shape index: {}]   ;;  %s906_s3 = inlined_call_operand.hbm [shape: f32[2,512], index: 3, kind: output, shape index: {}]  }
   0x1   :  { %9 = vsyncpa [#allocation6], 0 }
   0x2   :  { %11 = vsyncpa [#allocation6 + $0x1], 0 }
   0x3   :  { %12 = vsyncpa [#allocation4], 0 }
   0x4   :  { %14 = vsyncpa [#allocation4 + $0x1], 0  ;;  %s693_s12 = smov 0   ;;  %s695_s13 = smov 0  }
   0x5   :  { %s697_s14 = smov 0   ;;  %s699_s15 = smov 0  }
   0x6 LB: > { %s714_s16 = sadd.s32 1, %s665_s15   ;;  %s48_s17 = sadd.s32 1, %s661_s14  ;;  %s665_s15 = sphi %s699_s15, %s930_s15   ;;  %s661_s14 = sphi %s697_s14, %s929_s14   ;;  %s657_s13 = sphi %s695_s13, %s928_s13   ;;  %s653_s12 = sphi %s693_s12, %s927_s12  }
   0x7   : > { %s45_s18 = ssub.s32 %s665_s15, %s714_s16  ;;  %p907_p0 = scmp.ne.s32.totalorder %s661_s14, %s657_s13 }
   0x8   : > { %p46_p1 = scmp.eq.s32.totalorder %s45_s18, 0  ;;  %p56_p2 = scmp.eq.s32.totalorder %s665_s15, 0 }
   0x9   : > { %p477_p3 = scmp.lt.s32.totalorder %s665_s15, 4  ;;  %s148_s20 = sand.u32 1, %s665_s15  }
   0xa   : > { %s724_s19 = scalar_select %p46_p1, %s661_s14, %s48_s17  }
   0xb   : > { %p57_p4 = por %p56_p2, %p907_p0  ;;  %s150_s21 = sand.u32 1, %s661_s14  }
   0xc   : > { %s431_s22 = sshll.u32 %s150_s21, 3  ;;  %s432_s23 = sshll.u32 %s665_s15, 7 }
   0xd   : > { %s737_s26 = scalar_lea.hbm %s904_s1, %s432_s23  ;;  %s152_s27 = scalar_lea.vmem [#allocation5], %s431_s22 }
   0xe   : > { %s159_s28 = sshll.u32 %s152_s27, 4  ;;  %p739_p5 = pnand %p477_p3, %p57_p4  ;;  %s160_s28 = int_to_ptr.vmem [resolvable:$true] %s159_s28 }
   0xf   : > { %s743_s30 = scalar_lea.sflag [#allocation6], %s148_s20  ;;  %s515_s4 = scalar_lea.hbm %s737_s26, 128 }
  0x10   : > { %p516_p6 = scmp.ne.s32.totalorder %s737_s26, %s515_s4  ;;  %p517_p7 = pneg %p739_p5 }
  0x11   : > { %s520_s7 = scalar_lea.hbm %s904_s1, 512  ;;  %p521_p10 = scmp.lt.s32.totalorder %s737_s26, %s904_s1 }
  0x12   : > { %p518_p8 = pnand %p517_p7, %p516_p6  ;;  %p522_p11 = scmp.lt.s32.totalorder %s520_s7, %s515_s4 }
  0x14   : > { %p519_p9 = pneg %p518_p8  ;;  %p523_p12 = por %p522_p11, %p521_p10 }
  0x16   : > { %p524_p13 = pnand %p523_p12, %p519_p9 }
  0x18   : > { %527 = shalt.err (!%p524_p13)
}
  0x19   : > { %s528_s10 = scalar_lea.vmem %s160_s28, 128  ;;  %s667_s11 = smov [#allocation5]  }
  0x1a   : > { %p529_p1 = scmp.ne.s32.totalorder %s160_s28, %s528_s10  ;;  %s533_s17 = sshll.u32 %s667_s11, 4  ;;  %s534_s17 = int_to_ptr.vmem [resolvable:$false] %s533_s17 }
  0x1b   : > { %s535_s18 = scalar_lea.vmem %s534_s17, 256  ;;  %p536_p4 = scmp.lt.s32.totalorder %s160_s28, %s534_s17 }
  0x1c   : > { %p531_p2 = pnand %p529_p1, %p517_p7  ;;  %p537_p6 = scmp.lt.s32.totalorder %s535_s18, %s528_s10 }
  0x1e   : > { %p532_p3 = pneg %p531_p2  ;;  %p538_p8 = por %p537_p6, %p536_p4 }
  0x20   : > { %p539_p0 = pnand %p538_p8, %p532_p3 }
  0x22   : > { %542 = shalt.err (!%p539_p0)
}
  0x23   : > { %468 = dma.hbm_to_vmem [thread:$0]  (!%p739_p5), %s737_s26, 128, %s160_s28, %s743_s30  }
  0x24   : > { %s767_s20 = sadd.s32 4294967295, %s665_s15   ;;  %s427_s22 = sadd.s32 4294967294, %s665_s15  }
  0x25   : > { %p61_p0 = scmp.ne.s32.totalorder %s657_s13, %s653_s12  ;;  %p908_p9 = scmp.eq.s32.totalorder %s767_s20, 0 }
  0x26   : > { %p111_p10 = scmp.eq.s32.totalorder %s767_s20, 3  ;;  %p117_p11 = scmp.eq.s32.totalorder %s427_s22, 3 }
  0x27   : > { %p776_p12 = por %p908_p9, %p61_p0  ;;  %p428_p13 = scmp.ge.s32.totalorder %s665_s15, 1 }
  0x28   : > { %p915_p1 = scmp.ne.s32.totalorder %s661_s14, %s657_s13  ;;  %p788_p3 = por %p117_p11, %p61_p0 }
  0x29   : > { %s914_s23 = scalar_select %p776_p12, 1, 0 }
  0x2a   : > { %p784_p2 = por %p111_p10, %p915_p1  ;;  %p124_p4 = scmp.lt.s32.totalorder %s665_s15, 5 }
  0x2b   : > { %s917_s25 = scalar_select %p788_p3, 1, 0 }
  0x2c   : > { %s916_s24 = scalar_select %p784_p2, 1, 0 }
  0x2d   : > { %p793_p6 = pnand %p428_p13, %p124_p4  ;;  %s668_s27 = smov [#allocation2]  }
  0x2e   : > { %s137_s28 = sshll.u32 %s668_s27, 4  ;;  %s433_s4 = sshll.u32 %s665_s15, 4  ;;  %s805_s28 = int_to_ptr.vmem [resolvable:$true] %s137_s28 }
  0x2f   : > { %s918_s26 = scalar_select %p793_p6, 1, 0 }
  0x30   : > { %p461_p8 = pneg %p793_p6  ;;  %s803_s7 = scalar_lea.hbm %s905_s2, %s433_s4 }
  0x31   : > { %s169_s8 = scalar_lea.vmem [#allocation7], %s150_s21  ;;  %s543_s11 = scalar_lea.hbm %s803_s7, 16 }
  0x32   : > { %s176_s9 = sshll.u32 %s169_s8, 4  ;;  %p811_p0 = pnand %p461_p8, %p908_p9  ;;  %s177_s9 = int_to_ptr.vmem [resolvable:$true] %s176_s9 }
  0x33   : > { %p544_p10 = scmp.ne.s32.totalorder %s803_s7, %s543_s11  ;;  %s548_s22 = scalar_lea.hbm %s905_s2, 64 }
  0x34   : > { %s919_s10 = scalar_select %p811_p0, 1, 0 }
  0x35   : > { %p546_p11 = pnand %p544_p10, %p517_p7  ;;  %p549_p1 = scmp.lt.s32.totalorder %s803_s7, %s905_s2 }
  0x36   : > { %p550_p4 = scmp.lt.s32.totalorder %s548_s22, %s543_s11 }
  0x37   : > { %p547_p13 = pneg %p546_p11 }
  0x38   : > { %p551_p8 = por %p550_p4, %p549_p1 }
  0x3a   : > { %p552_p9 = pnand %p551_p8, %p547_p13 }
  0x3c   : > { %555 = shalt.err (!%p552_p9)
}
  0x3d   : > { %s556_s21 = scalar_lea.vmem %s177_s9, 16  ;;  %s669_s5 = smov [#allocation7]  }
  0x3e   : > { %p557_p3 = scmp.ne.s32.totalorder %s177_s9, %s556_s21  ;;  %s561_s6 = sshll.u32 %s669_s5, 4  ;;  %s562_s6 = int_to_ptr.vmem [resolvable:$false] %s561_s6 }
  0x3f   : > { %s563_s8 = scalar_lea.vmem %s562_s6, 32  ;;  %p564_p11 = scmp.lt.s32.totalorder %s177_s9, %s562_s6 }
  0x40   : > { %p559_p2 = pnand %p557_p3, %p517_p7  ;;  %p565_p12 = scmp.lt.s32.totalorder %s563_s8, %s556_s21 }
  0x42   : > { %p560_p10 = pneg %p559_p2  ;;  %p566_p6 = por %p565_p12, %p564_p11 }
  0x44   : > { %p567_p0 = pnand %p566_p6, %p560_p10 }
  0x46   : > { %570 = shalt.err (!%p567_p0)
}
  0x47   : > { %471 = dma.hbm_to_vmem [thread:$0]  (!%p739_p5), %s803_s7, 16, %s177_s9, %s743_s30  }
  0x48   : > { %p920_p7 = scmp.ne.s32.totalorder %s919_s10, 0  ;;  %s582_s11 = scalar_lea.vmem %s805_s28, 32 }
  0x49   : > { %p583_p2 = scmp.ne.s32.totalorder %s805_s28, %s582_s11  ;;  %p590_p1 = scmp.lt.s32.totalorder %s805_s28, %s805_s28 }
  0x4a   : > { %p573_p9 = pneg %p920_p7  ;;  %p591_p12 = scmp.lt.s32.totalorder %s582_s11, %s582_s11 }
  0x4c   : > { %p585_p3 = pnand %p583_p2, %p573_p9  ;;  %p592_p6 = por %p591_p12, %p590_p1 }
  0x4e   : > { %p586_p13 = pneg %p585_p3 }
  0x50   : > { %p593_p0 = pnand %p592_p6, %p586_p13 }
  0x52   : > { %596 = shalt.err (!%p593_p0)
}
  0x53   : > { %464 = dma.hbm_to_vmem [thread:$0]  (!%p920_p7), %s903_s0, 32, %s805_s28, [#allocation3]  }
  0x54   : > { %p921_p5 = scmp.ne.s32.totalorder %s918_s26, 0 }
  0x55   : > { %p922_p4 = scmp.eq.s32.totalorder (!%p921_p5), %s767_s20, 0 }
  0x56   : > { %185 = sbr.rel (%p921_p5) target bundleno = 308 (0x134), region = 32 }
  0x5b   : > { %640 = dma.done.wait (%p922_p4), [#allocation3], 32   ;;  %p923_p8 = pmov %p922_p4 }
  0x5c   : > { %s191_s30 = sand.u32 1, %s767_s20   ;;  %s854_s7 = sand.u32 1, %s657_s13  }
  0x5d   : > { %642 = vsyncadd (%p923_p8), [#allocation3], 4294967264  ;;  %s436_s9 = sshll.u32 %s854_s7, 3  ;;  %s192_s10 = scalar_lea.sflag [#allocation6], %s191_s30 }
  0x5e   : > { %s195_s18 = scalar_lea.vmem [#allocation5], %s436_s9  ;;  %p924_p10 = scmp.ne.s32.totalorder %s914_s23, 0 }
  0x60   : > { %644 = dma.done.wait (%p924_p10), %s192_s10, 144  }
  0x61   : > { %646 = vsyncadd (%p924_p10), %s192_s10, 4294967152  ;;  %v670_v0 = vmov 0.0   ;;  %vm671_vm0 = vmmov 0   ;;  %vm239_vm1 = vcmask 64512   ;;  %v231_v1 = vld [vmem:[%s195_s18] sm:$0xff]  ;;  %s437_s26 = sshll.u32 %s854_s7, 1 }
  0x62   : > { %446 = vmatprep.subr.mxu0 %v670_v0  ;;  %448 = vmatprep.mubr.msk.f32.mxu0 %vm671_vm0, %v670_v0  ;;  %v230_v2 = vld [vmem:[#allocation2] sm:$0x3]  ;;  %s203_s28 = scalar_lea.vmem [#allocation7], %s854_s7  ;;  %s441_s22 = sshll.u32 %s767_s20, 5 }
  0x63   : > { %447 = vmatpush3.msra.mxu0 %v231_v1  ;;  %v438_v3 = vld [vmem:[%s203_s28] ss:$0 sm:$0xff]  ;;  %s229_s23 = scalar_lea.vmem [#allocation8], %s437_s26  ;;  %s867_s5 = scalar_lea.hbm %s906_s3, %s441_s22 }
  0x64   : > { %449 = vmatmul.mubr.msk.f32.vlgmr.msra.gmra.mxu0 %vm239_vm1, %v230_v2  ;;  %s328_s27 = sshll.u32 %s229_s23, 4  ;;  %s315_s6 = scalar_lea.sflag [#allocation4], %s854_s7  ;;  %s329_s27 = int_to_ptr.vmem [resolvable:$true] %s328_s27 }
  0x65   : > { %s597_s8 = scalar_lea.vmem %s329_s27, 32  ;;  %p925_p7 = scmp.ne.s32.totalorder %s916_s24, 0 }
  0x66   : > { %p598_p11 = scmp.ne.s32.totalorder %s329_s27, %s597_s8  ;;  %s672_s11 = smov [#allocation8]  }
  0x67   : > { %s601_s20 = sshll.u32 %s672_s11, 4  ;;  %s602_s20 = int_to_ptr.vmem [resolvable:$false] %s601_s20 }
  0x68   : > { %p599_p9 = pnand %p598_p11, %p925_p7  ;;  %s603_s29 = scalar_lea.vmem %s602_s20, 64 }
  0x69   : > { %p604_p3 = scmp.lt.s32.totalorder %s329_s27, %s602_s20  ;;  %p605_p13 = scmp.lt.s32.totalorder %s603_s29, %s597_s8 }
  0x6a   : > { %p600_p2 = pneg %p599_p9 }
  0x6b   : > { %p606_p1 = por %p605_p13, %p604_p3 }
  0x6d   : > { %p607_p12 = pnand %p606_p1, %p600_p2 }
 0x124   : > { %v309_v4 = vpop.f32.mrf.mxu0 }
 0x125   : > { %v310_v5 = vadd.f32 %v438_v3, %v309_v4 }
 0x126   : > { %v450_v6 = vpop.f32.mrf.mxu0 }
 0x127   : > { %313 = vst [vmem:[%s229_s23] sm:$0x3] %v310_v5 }
 0x128   : > { %610 = shalt.err (!%p607_p12)
}
 0x129   : > { %s611_s17 = scalar_lea.hbm %s867_s5, 32  ;;  %s615_s9 = scalar_lea.hbm %s906_s3, 128 }
 0x12a   : > { %p612_p6 = scmp.ne.s32.totalorder %s867_s5, %s611_s17  ;;  %p616_p4 = scmp.lt.s32.totalorder %s867_s5, %s906_s3 }
 0x12b   : > { %p617_p8 = scmp.lt.s32.totalorder %s615_s9, %s611_s17 }
 0x12c   : > { %p613_p0 = pnand %p612_p6, %p925_p7 }
 0x12d   : > { %p618_p10 = por %p617_p8, %p616_p4 }
 0x12e   : > { %p614_p5 = pneg %p613_p0 }
 0x130   : > { %p619_p11 = pnand %p618_p10, %p614_p5 }
 0x132   : > { %622 = shalt.err (!%p619_p11)
}
 0x133   : > { %459 = dma.vmem_to_hbm [thread:$0]  (%p925_p7), %s329_s27, 32, %s867_s5, %s315_s6  }
 0x134 PF: > { %p479_p9 = scmp.ge.s32.totalorder %s665_s15, 2  ;;  %s340_s26 = sand.u32 1, %s653_s12  }
 0x135   : > { %p926_p2 = scmp.ne.s32.totalorder %s917_s25, 0  ;;  %s341_s28 = scalar_lea.sflag [#allocation4], %s340_s26 }
 0x137   : > { %p473_p3 = pnand %p479_p9, %p926_p2 }
 0x139   : > { %p474_p13 = pneg %p473_p3 }
 0x13b   : > { %648 = dma.done.wait (%p474_p13), %s341_s28, 32  }
 0x13c   : > { %650 = vsyncadd (%p474_p13), %s341_s28, 4294967264  ;;  %p17_p1 = scmp.ge.s32.totalorder %s714_s16, 6   ;;  %s927_s12 = smov %s657_s13 }
 0x13d   : > { %s928_s13 = smov %s661_s14  ;;  %s929_s14 = smov %s724_s19 }
 0x13e   : > { %s930_s15 = smov %s714_s16  ;;  %19 = sbr.rel (!%p17_p1) target bundleno = 6 (0x6), region = 93 }
 0x143   :  { %346 = vsyncpa [#allocation3], 1 }
 0x144   :  { %348 = vsyncpa [#allocation3 + $0x1], 1 }
 0x145   :  { %349 = vsyncpa [#allocation6], 1 }
 0x146   :  { %351 = vsyncpa [#allocation6 + $0x1], 1 }
 0x147   :  { %352 = vsyncpa [#allocation4], 1 }
 0x148   :  { %354 = vsyncpa [#allocation4 + $0x1], 1 }

</bundles_post_ra>
